<compile_context>
chip_gen: v5e
topology: v5e:2x2
jax: 0.10.0
libtpu: 0.0.40
codegen_flags: <defaults>
</compile_context>

<pallas_src>
import jax
import jax.numpy as jnp
from jax.experimental import pallas as pl
from jax.experimental.pallas import tpu as pltpu


def mlp_kernel(x_ref, w1_ref, b1_ref, w2_ref, b2_ref, o_ref):
    # x arrives f32; cast to bf16 in-kernel (rides the VPU under DMA/MXU).
    x = x_ref[...].astype(jnp.bfloat16)                                # [tb, D_in] bf16
    h = jnp.dot(x, w1_ref[...], preferred_element_type=jnp.float32)    # [tb, H] f32 (MXU)
    h = jnp.maximum(h + b1_ref[...], 0.0)                              # f32 bias + ReLU (VPU)
    y = jnp.dot(h.astype(jnp.bfloat16), w2_ref[...],
                preferred_element_type=jnp.float32)                    # [tb, D_out] f32 (MXU)
    o_ref[...] = (y + b2_ref[...]).astype(o_ref.dtype)


def prepare_params(w1, b1, w2, b2):
    """One-time weight prep (cast / reshape). Cache the result and reuse."""
    return (w1.astype(jnp.bfloat16),
            b1.astype(jnp.float32).reshape(1, -1),
            w2.astype(jnp.bfloat16),
            b2.astype(jnp.float32).reshape(1, -1))


def mlp_forward(x, params, *, batch_tile=1024, single_shot_max=8192):
    """y = relu(x @ w1 + b1) @ w2 + b2, fused in one Pallas kernel.

    `params` must come from `prepare_params` (hoisted, cached casts).
    """
    w1_bf, b1f, w2_bf, b2f = params
    B, D_in = x.shape
    H, D_out = w2_bf.shape

    if B <= single_shot_max:
        # Single invocation: whole arrays pinned in VMEM, no grid, no
        # pipeline/double-buffering machinery. (Everything fits trivially:
        # x <= 1 MiB, y <= 512 KiB, weights ~40 KiB.)
        vmem = pl.BlockSpec(memory_space=pltpu.MemorySpace.VMEM)
        y = pl.pallas_call(
            mlp_kernel,
            out_shape=jax.ShapeDtypeStruct((B, D_out), jnp.float32),
            in_specs=[vmem, vmem, vmem, vmem, vmem],
            out_specs=vmem,
        )(x, w1_bf, b1f, w2_bf, b2f)
    else:
        # Batch-tiled path: weights/biases resident (constant index_map),
        # x / y stream; batch axis "parallel" (megacore / 2 TCs on v7x).
        # cdiv grid handles ragged B via Pallas edge-block masking.
        tb = batch_tile
        y = pl.pallas_call(
            mlp_kernel,
            out_shape=jax.ShapeDtypeStruct((B, D_out), jnp.float32),
            grid_spec=pltpu.PrefetchScalarGridSpec(
                num_scalar_prefetch=0,
                grid=(pl.cdiv(B, tb),),
                in_specs=[
                    pl.BlockSpec((tb, D_in), lambda i: (i, 0)),
                    pl.BlockSpec((D_in, H), lambda i: (0, 0)),
                    pl.BlockSpec((1, H), lambda i: (0, 0)),
                    pl.BlockSpec((H, D_out), lambda i: (0, 0)),
                    pl.BlockSpec((1, D_out), lambda i: (0, 0)),
                ],
                out_specs=pl.BlockSpec((tb, D_out), lambda i: (i, 0)),
            ),
            compiler_params=pltpu.CompilerParams(
                dimension_semantics=("parallel",)),
        )(x, w1_bf, b1f, w2_bf, b2f)

    return y.astype(x.dtype)


def init_params(key, input_dim, hidden_dim, output_dim):
    # Deterministic init mimicking nn.Linear's uniform(-1/sqrt(fan_in), 1/sqrt(fan_in)).
    k1, k2, k3, k4 = jax.random.split(key, 4)
    lim1 = 1.0 / jnp.sqrt(input_dim)
    lim2 = 1.0 / jnp.sqrt(hidden_dim)
    w1 = jax.random.uniform(k1, (input_dim, hidden_dim), jnp.float32, -lim1, lim1)
    b1 = jax.random.uniform(k2, (1, hidden_dim), jnp.float32, -lim1, lim1)
    w2 = jax.random.uniform(k3, (hidden_dim, output_dim), jnp.float32, -lim2, lim2)
    b2 = jax.random.uniform(k4, (1, output_dim), jnp.float32, -lim2, lim2)
    return w1, b1, w2, b2


def reference_bf16(x, w1, b1, w2, b2):
    # Pure-JAX reference matching the kernel's precision (bf16 MXU operands,
    # f32 accumulation, f32 bias/ReLU).
    xb, w1b, w2b = (t.astype(jnp.bfloat16) for t in (x, w1, w2))
    h = jnp.dot(xb, w1b, preferred_element_type=jnp.float32) + b1
    h = jnp.maximum(h, 0.0)
    return jnp.dot(h.astype(jnp.bfloat16), w2b, preferred_element_type=jnp.float32) + b2


if __name__ == "__main__":
    INPUT_DIM = 32
    HIDDEN_DIM = 128   # fixed by the module definition
    OUTPUT_DIM = 16
    BATCH_SMALL = 8
    BATCH_LARGE = 2304  # ragged vs. tile size -> exercises cdiv edge block

    key = jax.random.PRNGKey(0)
    kx1, kx2, kp = jax.random.split(key, 3)
    w1, b1, w2, b2 = init_params(kp, INPUT_DIM, HIDDEN_DIM, OUTPUT_DIM)
    params = prepare_params(w1, b1, w2, b2)   # hoisted, one-time weight prep

    # --- small batch: single-shot, no-grid path ---
    x_s = jax.random.normal(kx1, (BATCH_SMALL, INPUT_DIM), dtype=jnp.float32)
    out_s = mlp_forward(x_s, params)
    jax.block_until_ready(out_s)
    assert out_s.shape == (BATCH_SMALL, OUTPUT_DIM)
    ref_s = reference_bf16(x_s, w1, b1, w2, b2)
    ref_f32 = jnp.maximum(x_s @ w1 + b1, 0.0) @ w2 + b2
    assert jnp.allclose(out_s, ref_s, atol=1e-3, rtol=1e-3)
    assert jnp.allclose(out_s, ref_f32, atol=5e-2, rtol=5e-2)

    # --- larger ragged batch: B-tiled, parallel-grid path (forced via
    #     single_shot_max) with a partial last block handled by Pallas ---
    x_l = jax.random.normal(kx2, (BATCH_LARGE, INPUT_DIM), dtype=jnp.float32)
    out_l = mlp_forward(x_l, params, batch_tile=1024, single_shot_max=1024)
    jax.block_until_ready(out_l)
    assert out_l.shape == (BATCH_LARGE, OUTPUT_DIM)
    ref_l = reference_bf16(x_l, w1, b1, w2, b2)
    assert jnp.allclose(out_l, ref_l, atol=1e-3, rtol=1e-3)

    print("KERNEL_OK")
</pallas_src>

<mosaic_0001>
module attributes {stable_mosaic.version = 11 : i64} {
  func.func @mlp_kernel(%arg0: memref<8x32xf32, #tpu.memory_space<vmem>>, %arg1: memref<32x128xbf16, #tpu.memory_space<vmem>>, %arg2: memref<1x128xf32, #tpu.memory_space<vmem>>, %arg3: memref<128x16xbf16, #tpu.memory_space<vmem>>, %arg4: memref<1x16xf32, #tpu.memory_space<vmem>>, %arg5: memref<8x16xf32, #tpu.memory_space<vmem>>) attributes {dimension_semantics = [], scalar_prefetch = 0 : i64, scratch_operands = 0 : i64, tpu.core_type = #tpu.core_type<tc>} {
    %c0 = arith.constant 0 : index
    %c0_0 = arith.constant 0 : index
    %0 = vector.load %arg0[%c0, %c0_0] : memref<8x32xf32, #tpu.memory_space<vmem>>, vector<8x32xf32>
    %1 = arith.truncf %0 : vector<8x32xf32> to vector<8x32xbf16>
    %c0_1 = arith.constant 0 : index
    %c0_2 = arith.constant 0 : index
    %2 = vector.load %arg1[%c0_1, %c0_2] : memref<32x128xbf16, #tpu.memory_space<vmem>>, vector<32x128xbf16>
    %cst = arith.constant dense<0.000000e+00> : vector<8x128xf32>
    %3 = tpu.matmul %1, %2, %cst {dimension_numbers = #tpu.dot_dimension_numbers<[1], [0], [0], [1], [0, 0, 1, 1], [], []>} : vector<8x32xbf16>, vector<32x128xbf16>, vector<8x128xf32> -> vector<8x128xf32>
    %c0_3 = arith.constant 0 : index
    %c0_4 = arith.constant 0 : index
    %4 = vector.load %arg2[%c0_3, %c0_4] : memref<1x128xf32, #tpu.memory_space<vmem>>, vector<1x128xf32>
    %5 = vector.broadcast %4 : vector<1x128xf32> to vector<8x128xf32>
    %6 = arith.addf %3, %5 : vector<8x128xf32>
    %cst_5 = arith.constant 0.000000e+00 : f32
    %7 = vector.broadcast %cst_5 : f32 to vector<8x128xf32>
    %8 = arith.maximumf %6, %7 : vector<8x128xf32>
    %9 = arith.truncf %8 : vector<8x128xf32> to vector<8x128xbf16>
    %c0_6 = arith.constant 0 : index
    %c0_7 = arith.constant 0 : index
    %10 = vector.load %arg3[%c0_6, %c0_7] : memref<128x16xbf16, #tpu.memory_space<vmem>>, vector<128x16xbf16>
    %cst_8 = arith.constant dense<0.000000e+00> : vector<8x16xf32>
    %11 = tpu.matmul %9, %10, %cst_8 {dimension_numbers = #tpu.dot_dimension_numbers<[1], [0], [0], [1], [0, 0, 1, 1], [], []>} : vector<8x128xbf16>, vector<128x16xbf16>, vector<8x16xf32> -> vector<8x16xf32>
    %c0_9 = arith.constant 0 : index
    %c0_10 = arith.constant 0 : index
    %12 = vector.load %arg4[%c0_9, %c0_10] : memref<1x16xf32, #tpu.memory_space<vmem>>, vector<1x16xf32>
    %13 = vector.broadcast %12 : vector<1x16xf32> to vector<8x16xf32>
    %14 = arith.addf %11, %13 : vector<8x16xf32>
    %c0_11 = arith.constant 0 : index
    %c0_12 = arith.constant 0 : index
    %15 = vector.load %arg5[%c0_11, %c0_12] : memref<8x16xf32, #tpu.memory_space<vmem>>, vector<8x16xf32>
    tpu.vector_store %arg5[%c0_11, %c0_12], %14 {strides = array<i32>} : memref<8x16xf32, #tpu.memory_space<vmem>>, vector<8x16xf32>,
    return
  }
}

</mosaic_0001>

<bundles_post_ra>
// kernel: tpu_custom_call.1
= control target key start
LH: loop header
LB: loop body
LE: loop exit
PB: predicated region body
PF: predicated region fallthrough
CT: control target
= control target key end

     0   :  { %s315_s0 = inlined_call_operand.vmem [shape: f32[8,32], index: 0, kind: input, shape index: {}]   ;;  %s316_s1 = inlined_call_operand.vmem [shape: bf16[32,128], index: 1, kind: input, shape index: {}]   ;;  %s317_s2 = inlined_call_operand.vmem [shape: f32[1,128], index: 2, kind: input, shape index: {}]   ;;  %s318_s3 = inlined_call_operand.vmem [shape: bf16[128,16], index: 3, kind: input, shape index: {}]   ;;  %s319_s4 = inlined_call_operand.vmem [shape: f32[1,16], index: 4, kind: input, shape index: {}]   ;;  %s320_s5 = inlined_call_operand.hbm [shape: f32[8,16], index: 5, kind: output, shape index: {}]  }
   0x1   :  { %v204_v0 = vld [vmem:[%s316_s1 + $0x8] sm:$0xff]  ;;  %v212_v1 = vld [vmem:[%s318_s3 + $0x38] sm:$0xff]  ;;  %v203_v2 = vld [vmem:[%s316_s1] sm:$0xff] }
   0x2   :  { %54 = vmatpush.bf16.msra.mxu0 %v204_v0  ;;  %v22_v3 = vld [vmem:[%s315_s0] sm:$0xff]  ;;  %131 = vmatpush.bf16.msra.mxu1 %v212_v1  ;;  %v211_v4 = vld [vmem:[%s318_s3 + $0x30] sm:$0xff] }
   0x3   :  { %10 = vsyncpa [#allocation3], 0  ;;  %v23_v5 = vpack.c.bf16 %v22_v3, %v22_v3  ;;  %vm44_vm0 = vcmask 261120   ;;  %v210_v6 = vld [vmem:[%s318_s3 + $0x28] sm:$0xff]  ;;  %v209_v7 = vld [vmem:[%s318_s3 + $0x20] sm:$0xff]  ;;  %s242_s17 = smov [#allocation2]  }
   0x4   :  { %v208_v8 = vld [vmem:[%s318_s3 + $0x18] sm:$0xff]  ;;  %v207_v9 = vld [vmem:[%s318_s3 + $0x10] sm:$0xff]  ;;  %v206_v10 = vld [vmem:[%s318_s3 + $0x8] sm:$0xff]  ;;  %s151_s18 = sshll.u32 %s242_s17, 4  ;;  %vm144_vm1 = vcmask 130048   ;;  %s152_s18 = int_to_ptr.vmem [resolvable:$true] %s151_s18 }
   0x5   :  { %v205_v11 = vld [vmem:[%s318_s3] sm:$0xff]  ;;  %s153_s3 = sshll.u32 %s320_s5, 4  ;;  %s154_s3 = int_to_ptr.hbm [resolvable:$true] %s153_s3 }
   0x6   :  { %55 = vmatpush.bf16.msra.mxu0 %v203_v2  ;;  %132 = vmatpush.bf16.msra.mxu1 %v211_v4  ;;  %v214_v12 = vld [vmem:[%s317_s2] ss:$0 sm:$0xff] }
   0x7   :  { %v215_v18 = vld [vmem:[%s319_s4] ss:$0 sm:$0xff] }
   0x9   :  { %170 = vmatmul.msk.bf16.vlgmr.msra.gmra.mxu0 %vm44_vm0, %v23_v5 }
   0xa   :  { %133 = vmatpush.bf16.msra.mxu1 %v210_v6 }
   0xe   :  { %134 = vmatpush.bf16.msra.mxu1 %v209_v7 }
  0x12   :  { %135 = vmatpush.bf16.msra.mxu1 %v208_v8 }
  0x16   :  { %136 = vmatpush.bf16.msra.mxu1 %v207_v9 }
  0x1a   :  { %137 = vmatpush.bf16.msra.mxu1 %v206_v10 }
  0x1e   :  { %138 = vmatpush.bf16.msra.mxu1 %v205_v11 }
  0x86   :  { %v57_v13 = vpop.f32.mrf.mxu0 }
  0x87   :  { %v58_v14 = vadd.f32 %v214_v12, %v57_v13 }
  0x89   :  { %v61_v15 = vmax.f32 %v58_v14, 0.0 }
  0x8b   :  { %v62_v16 = vpack.c.bf16 %v61_v15, %v61_v15 }
  0x8d   :  { %139 = vmatmul.bf16.vlgmr.msra.gmra.mxu1 %v62_v16 }
  0x8e   :  { %v59_v17 = vpop.f32.mrf.mxu0 }
 0x10a   :  { %v140_v19 = vpop.f32.mrf.mxu1 }
 0x10b   :  { %v141_v20 = vadd.f32 %v215_v18, %v140_v19 }
 0x10d   :  { %145 = vst.msk [vmem:[#allocation2] sm:$0xff] %vm144_vm1, %v141_v20 }
 0x10e   :  { %156 = dma.vmem_to_hbm [thread:$0]  %s152_s18, 128, %s154_s3, [#allocation3]  }
 0x112   :  { %v142_v21 = vpop.f32.mrf.mxu1 }
 0x113   :  { %240 = dma.done.wait [#allocation3], 128  }
 0x114   :  { %241 = vsyncadd [#allocation3], 4294967168 }
 0x115   :  { %161 = vsyncpa [#allocation3], 1 }

</bundles_post_ra>
